<compile_context>
chip_gen: v7x
topology: tpu7x:2x2x1
jax: 0.10.0
libtpu: 0.0.40
codegen_flags: <defaults>
</compile_context>

<pallas_src>
import math
import functools

import numpy as np
import jax
import jax.numpy as jnp
from jax import lax
from jax.experimental import pallas as pl
from jax.experimental.pallas import tpu as pltpu


def _to_2tuple(v):
    return tuple(v) if isinstance(v, (tuple, list)) else (v, v)


def _round_up(x, m):
    return ((x + m - 1) // m) * m


def _get_static_padding(kernel_size, stride, dilation):
    # mirrors timm get_padding (used by get_padding_value for padding='')
    return tuple(((s - 1) + d * (k - 1)) // 2
                 for k, s, d in zip(kernel_size, stride, dilation))


def _condconv_kernel(routing_ref, patch_ref, w_ref, bias_ref, out_ref, w_mix_ref,
                     *, num_experts):
    """Grid = (B, num_hw_tiles); one step = one HW tile of one batch sample.

    routing_ref: SMEM  [B, E]              f32   (scalar reads)
    patch_ref  : VMEM  [HW_TILE, KCIN_P]   bf16  (this tile's im2col patches)
    w_ref      : VMEM  [E, KCIN_P, COUT_P] bf16  (all expert weights, grid-invariant)
    bias_ref   : VMEM  [E, COUT_P]         f32   (all expert biases)
    out_ref    : VMEM  [HW_TILE, COUT_P]   f32
    w_mix_ref  : VMEM scratch [KCIN_P, COUT_P] bf16  (per-sample mixed weights)
    """
    b = pl.program_id(0)
    t = pl.program_id(1)

    # Mix the expert weights on the VPU once per sample; reuse for every HW tile of b.
    @pl.when(t == 0)
    def _():
        w_mix = routing_ref[b, 0] * w_ref[0].astype(jnp.float32)
        for e in range(1, num_experts):
            w_mix = w_mix + routing_ref[b, e] * w_ref[e].astype(jnp.float32)
        w_mix_ref[...] = w_mix.astype(w_mix_ref.dtype)

    # Mixed bias (tiny, (1, COUT_P)); recomputed per tile, negligible cost.
    b_mix = routing_ref[b, 0] * bias_ref[pl.ds(0, 1), :]
    for e in range(1, num_experts):
        b_mix = b_mix + routing_ref[b, e] * bias_ref[pl.ds(e, 1), :]

    # Single MXU matmul per tile; f32 accumulate; written straight to the output block.
    y = jnp.dot(patch_ref[...], w_mix_ref[...], preferred_element_type=jnp.float32)
    out_ref[...] = (y + b_mix).astype(out_ref.dtype)


class CondConv2d:
    """JAX/Pallas re-implementation of torchkit CondConv2d forward."""

    def __init__(self, in_channels, out_channels, kernel_size=(3, 3), stride=(1, 1),
                 padding='', dilation=(1, 1), groups=1, bias=False, num_experts=4,
                 key=None, dtype=jnp.float32, compute_dtype=jnp.bfloat16):
        assert groups == 1, "only groups=1 supported"
        self.in_channels = in_channels
        self.out_channels = out_channels
        self.kernel_size = _to_2tuple(kernel_size)
        self.stride = _to_2tuple(stride)
        self.dilation = _to_2tuple(dilation)
        self.groups = groups
        self.num_experts = num_experts
        self.compute_dtype = compute_dtype
        if isinstance(padding, str):
            # padding='' (module default) -> static symmetric "same-ish" padding.
            self.padding = _get_static_padding(self.kernel_size, self.stride, self.dilation)
        else:
            self.padding = _to_2tuple(padding)

        kh, kw = self.kernel_size
        fan_in = (in_channels // groups) * kh * kw
        bound = 1.0 / math.sqrt(fan_in)   # kaiming_uniform_(a=sqrt(5)) bound
        if key is None:
            key = jax.random.PRNGKey(0)
        wkey, bkey = jax.random.split(key)
        # expert weights, per-expert shape (Cout, Cin/groups, KH, KW)
        self.weight = jax.random.uniform(
            wkey, (num_experts, out_channels, in_channels // groups, kh, kw),
            dtype, -bound, bound)
        if bias:
            self.bias = jax.random.uniform(
                bkey, (num_experts, out_channels), dtype, -bound, bound)
        else:
            self.bias = jnp.zeros((num_experts, out_channels), dtype)

    def __call__(self, x, routing_weights):
        B, C, H, W = x.shape
        assert C == self.in_channels
        KH, KW = self.kernel_size
        SH, SW = self.stride
        DH, DW = self.dilation
        PH, PW = self.padding
        H_out = (H + 2 * PH - DH * (KH - 1) - 1) // SH + 1
        W_out = (W + 2 * PW - DW * (KW - 1) - 1) // SW + 1
        hw = H_out * W_out
        kcin = KH * KW * self.in_channels
        cout = self.out_channels
        E = self.num_experts

        # ---- tiling / padding choices ----
        kcin_p = _round_up(kcin, 128)            # lane-aligned K dim
        cout_p = _round_up(cout, 128)            # lane-dense output dim (unmasked vst)
        hw_tile = min(512, _round_up(hw, 8))     # bounded HW tile, multiple of 8
        hw_p = _round_up(hw, hw_tile)
        n_hw_tiles = hw_p // hw_tile

        # ---- glue: pad + im2col (pure data rearrangement), emitted in bf16 ----
        x_pad = jnp.pad(x, ((0, 0), (0, 0), (PH, PH), (PW, PW)))
        cols = []
        for kh in range(KH):
            for kw in range(KW):
                sl = x_pad[:, :,
                           kh * DH: kh * DH + (H_out - 1) * SH + 1: SH,
                           kw * DW: kw * DW + (W_out - 1) * SW + 1: SW]
                cols.append(sl)                              # (B, Cin, H_out, W_out)
        patches = jnp.stack(cols, axis=1)                    # (B, K*K, Cin, H_out, W_out)
        patches = patches.transpose(0, 3, 4, 1, 2)           # (B, H_out, W_out, K*K, Cin)
        patches = patches.reshape(B, hw, kcin)               # (B, HW, K*K*Cin)
        patches = jnp.pad(patches, ((0, 0), (0, hw_p - hw), (0, kcin_p - kcin)))
        patches = patches.astype(self.compute_dtype)

        # expert weights rearranged to match patch column order (kh, kw, ci), zero-padded
        w_mat = self.weight.transpose(0, 3, 4, 2, 1).reshape(E, kcin, cout)
        w_mat = jnp.pad(w_mat, ((0, 0), (0, kcin_p - kcin), (0, cout_p - cout)))
        w_mat = w_mat.astype(self.compute_dtype)
        bias_mat = jnp.pad(self.bias, ((0, 0), (0, cout_p - cout))).astype(jnp.float32)
        routing = routing_weights.astype(jnp.float32)

        kernel = functools.partial(_condconv_kernel, num_experts=E)
        out_flat = pl.pallas_call(
            kernel,
            out_shape=jax.ShapeDtypeStruct((B, hw_p, cout_p), jnp.float32),
            grid=(B, n_hw_tiles),
            in_specs=[
                pl.BlockSpec(memory_space=pltpu.MemorySpace.SMEM),            # routing [B, E]
                pl.BlockSpec((None, hw_tile, kcin_p), lambda b, t: (b, t, 0)),  # patches tile
                pl.BlockSpec((E, kcin_p, cout_p), lambda b, t: (0, 0, 0)),    # expert weights
                pl.BlockSpec((E, cout_p), lambda b, t: (0, 0)),               # expert biases
            ],
            out_specs=pl.BlockSpec((None, hw_tile, cout_p), lambda b, t: (b, t, 0)),
            scratch_shapes=[pltpu.VMEM((kcin_p, cout_p), self.compute_dtype)],  # mixed weights
            compiler_params=pltpu.CompilerParams(
                # B is parallel (megacore); HW-tile axis is ordered so the
                # pl.when(t==0) w_mix scratch init happens before its reuse.
                dimension_semantics=("parallel", "arbitrary"),
                vmem_limit_bytes=48 * 1024 * 1024,
            ),
        )(routing, patches, w_mat, bias_mat)

        # drop padding, back to NCHW
        out = out_flat[:, :hw, :cout]
        out = out.reshape(B, H_out, W_out, cout).transpose(0, 3, 1, 2)
        return out.astype(x.dtype)


def _reference(x, routing, weight, bias, stride, padding, dilation):
    """Pure-JAX reference matching the PyTorch semantics (mix weights, then conv)."""
    B = x.shape[0]
    mixed_w = jnp.einsum('be,eoikl->boikl', routing, weight)   # (B, Cout, Cin, KH, KW)
    mixed_b = routing @ bias                                   # (B, Cout)
    outs = []
    for b in range(B):
        o = lax.conv_general_dilated(
            x[b:b + 1], mixed_w[b],
            window_strides=stride,
            padding=[(padding[0], padding[0]), (padding[1], padding[1])],
            rhs_dilation=dilation,
            dimension_numbers=('NCHW', 'OIHW', 'NCHW'))
        outs.append(o[0] + mixed_b[b][:, None, None])
    return jnp.stack(outs, axis=0)


if __name__ == "__main__":
    key = jax.random.PRNGKey(0)
    kx, kr, kp = jax.random.split(key, 3)

    B, Cin, H, W = 2, 4, 16, 16
    Cout, E = 8, 4

    x = jax.random.normal(kx, (B, Cin, H, W), jnp.float32)
    # routing weights as in EfficientNet CondConv: sigmoid of a routing logit
    routing = jax.nn.sigmoid(jax.random.normal(kr, (B, E), jnp.float32))

    mod = CondConv2d(Cin, Cout, kernel_size=(3, 3), stride=(1, 1), padding='',
                     dilation=(1, 1), groups=1, bias=False, num_experts=E, key=kp)

    out = mod(x, routing)
    out = jax.block_until_ready(out)
    assert out.shape == (B, Cout, H, W), out.shape

    # The kernel computes the matmul in bf16 (per perf guidance); compare against the
    # f32 reference evaluated on the same bf16-quantized inputs so the check isolates
    # the kernel math (im2col + expert mixing + conv) rather than bf16 quantization.
    x_q = x.astype(jnp.bfloat16).astype(jnp.float32)
    w_q = mod.weight.astype(jnp.bfloat16).astype(jnp.float32)
    ref = _reference(x_q, routing, w_q, mod.bias.astype(jnp.float32),
                     mod.stride, mod.padding, mod.dilation)
    np.testing.assert_allclose(np.asarray(out), np.asarray(ref), rtol=1e-2, atol=1e-2)

    print("KERNEL_OK")
</pallas_src>

<mosaic_0001>
module attributes {stable_mosaic.version = 11 : i64} {
  func.func @_condconv_kernel(%arg0: i32, %arg1: i32, %arg2: memref<2x4xf32, #tpu.memory_space<smem>>, %arg3: memref<1x256x128xbf16, #tpu.memory_space<vmem>>, %arg4: memref<4x128x128xbf16, #tpu.memory_space<vmem>>, %arg5: memref<4x128xf32, #tpu.memory_space<vmem>>, %arg6: memref<1x256x128xf32, #tpu.memory_space<vmem>>, %arg7: memref<128x128xbf16, #tpu.memory_space<vmem>>) attributes {dimension_semantics = [#tpu.dimension_semantics<parallel>, #tpu.dimension_semantics<arbitrary>], iteration_bounds = array<i64: 2, 1>, scalar_prefetch = 0 : i64, scratch_operands = 1 : i64, tpu.core_type = #tpu.core_type<tc>, window_params = [{transform_indices = @transform_0, window_bounds = array<i64: 2, 4>}, {transform_indices = @transform_1, window_bounds = array<i64: 1, 256, 128>}, {pipeline_mode = #tpu.pipeline_mode<synchronous>, transform_indices = @transform_2, window_bounds = array<i64: 4, 128, 128>}, {pipeline_mode = #tpu.pipeline_mode<synchronous>, transform_indices = @transform_3, window_bounds = array<i64: 4, 128>}, {transform_indices = @transform_4, window_bounds = array<i64: 1, 256, 128>}]} {
    %c0_i32 = arith.constant 0 : i32
    %0 = arith.cmpi eq, %arg1, %c0_i32 : i32
    %1 = arith.extui %0 : i1 to i32
    %c0_i32_0 = arith.constant 0 : i32
    %2 = arith.cmpi ne, %1, %c0_i32_0 : i32
    scf.if %2 {
      %35 = arith.index_cast %arg0 : i32 to index
      %c0_17 = arith.constant 0 : index
      %36 = memref.load %arg2[%35, %c0_17] : memref<2x4xf32, #tpu.memory_space<smem>>
      %c0_18 = arith.constant 0 : index
      %c0_19 = arith.constant 0 : index
      %c0_20 = arith.constant 0 : index
      %37 = vector.load %arg4[%c0_18, %c0_19, %c0_20] : memref<4x128x128xbf16, #tpu.memory_space<vmem>>, vector<1x128x128xbf16>
      %38 = vector.shape_cast %37 : vector<1x128x128xbf16> to vector<128x128xbf16>
      %39 = arith.extf %38 : vector<128x128xbf16> to vector<128x128xf32>
      %40 = vector.broadcast %36 : f32 to vector<128x128xf32>
      %41 = arith.mulf %40, %39 : vector<128x128xf32>
      %42 = arith.index_cast %arg0 : i32 to index
      %c1_21 = arith.constant 1 : index
      %43 = memref.load %arg2[%42, %c1_21] : memref<2x4xf32, #tpu.memory_space<smem>>
      %c1_22 = arith.constant 1 : index
      %c0_23 = arith.constant 0 : index
      %c0_24 = arith.constant 0 : index
      %44 = vector.load %arg4[%c1_22, %c0_23, %c0_24] : memref<4x128x128xbf16, #tpu.memory_space<vmem>>, vector<1x128x128xbf16>
      %45 = vector.shape_cast %44 : vector<1x128x128xbf16> to vector<128x128xbf16>
      %46 = arith.extf %45 : vector<128x128xbf16> to vector<128x128xf32>
      %47 = vector.broadcast %43 : f32 to vector<128x128xf32>
      %48 = arith.mulf %47, %46 : vector<128x128xf32>
      %49 = arith.addf %41, %48 : vector<128x128xf32>
      %50 = arith.index_cast %arg0 : i32 to index
      %c2_25 = arith.constant 2 : index
      %51 = memref.load %arg2[%50, %c2_25] : memref<2x4xf32, #tpu.memory_space<smem>>
      %c2_26 = arith.constant 2 : index
      %c0_27 = arith.constant 0 : index
      %c0_28 = arith.constant 0 : index
      %52 = vector.load %arg4[%c2_26, %c0_27, %c0_28] : memref<4x128x128xbf16, #tpu.memory_space<vmem>>, vector<1x128x128xbf16>
      %53 = vector.shape_cast %52 : vector<1x128x128xbf16> to vector<128x128xbf16>
      %54 = arith.extf %53 : vector<128x128xbf16> to vector<128x128xf32>
      %55 = vector.broadcast %51 : f32 to vector<128x128xf32>
      %56 = arith.mulf %55, %54 : vector<128x128xf32>
      %57 = arith.addf %49, %56 : vector<128x128xf32>
      %58 = arith.index_cast %arg0 : i32 to index
      %c3_29 = arith.constant 3 : index
      %59 = memref.load %arg2[%58, %c3_29] : memref<2x4xf32, #tpu.memory_space<smem>>
      %c3_30 = arith.constant 3 : index
      %c0_31 = arith.constant 0 : index
      %c0_32 = arith.constant 0 : index
      %60 = vector.load %arg4[%c3_30, %c0_31, %c0_32] : memref<4x128x128xbf16, #tpu.memory_space<vmem>>, vector<1x128x128xbf16>
      %61 = vector.shape_cast %60 : vector<1x128x128xbf16> to vector<128x128xbf16>
      %62 = arith.extf %61 : vector<128x128xbf16> to vector<128x128xf32>
      %63 = vector.broadcast %59 : f32 to vector<128x128xf32>
      %64 = arith.mulf %63, %62 : vector<128x128xf32>
      %65 = arith.addf %57, %64 : vector<128x128xf32>
      %66 = arith.truncf %65 : vector<128x128xf32> to vector<128x128xbf16>
      %c0_33 = arith.constant 0 : index
      %c0_34 = arith.constant 0 : index
      %67 = vector.load %arg7[%c0_33, %c0_34] : memref<128x128xbf16, #tpu.memory_space<vmem>>, vector<128x128xbf16>
      tpu.vector_store %arg7[%c0_33, %c0_34], %66 {strides = array<i32>} : memref<128x128xbf16, #tpu.memory_space<vmem>>, vector<128x128xbf16>,
    } else {
    }
    %3 = arith.index_cast %arg0 : i32 to index
    %c0 = arith.constant 0 : index
    %4 = memref.load %arg2[%3, %c0] : memref<2x4xf32, #tpu.memory_space<smem>>
    %c0_1 = arith.constant 0 : index
    %c0_2 = arith.constant 0 : index
    %5 = vector.load %arg5[%c0_1, %c0_2] : memref<4x128xf32, #tpu.memory_space<vmem>>, vector<1x128xf32>
    %6 = vector.broadcast %4 : f32 to vector<1x128xf32>
    %7 = arith.mulf %6, %5 : vector<1x128xf32>
    %8 = arith.index_cast %arg0 : i32 to index
    %c1 = arith.constant 1 : index
    %9 = memref.load %arg2[%8, %c1] : memref<2x4xf32, #tpu.memory_space<smem>>
    %c1_3 = arith.constant 1 : index
    %c0_4 = arith.constant 0 : index
    %10 = vector.load %arg5[%c1_3, %c0_4] : memref<4x128xf32, #tpu.memory_space<vmem>>, vector<1x128xf32>
    %11 = vector.broadcast %9 : f32 to vector<1x128xf32>
    %12 = arith.mulf %11, %10 : vector<1x128xf32>
    %13 = arith.addf %7, %12 : vector<1x128xf32>
    %14 = arith.index_cast %arg0 : i32 to index
    %c2 = arith.constant 2 : index
    %15 = memref.load %arg2[%14, %c2] : memref<2x4xf32, #tpu.memory_space<smem>>
    %c2_5 = arith.constant 2 : index
    %c0_6 = arith.constant 0 : index
    %16 = vector.load %arg5[%c2_5, %c0_6] : memref<4x128xf32, #tpu.memory_space<vmem>>, vector<1x128xf32>
    %17 = vector.broadcast %15 : f32 to vector<1x128xf32>
    %18 = arith.mulf %17, %16 : vector<1x128xf32>
    %19 = arith.addf %13, %18 : vector<1x128xf32>
    %20 = arith.index_cast %arg0 : i32 to index
    %c3 = arith.constant 3 : index
    %21 = memref.load %arg2[%20, %c3] : memref<2x4xf32, #tpu.memory_space<smem>>
    %c3_7 = arith.constant 3 : index
    %c0_8 = arith.constant 0 : index
    %22 = vector.load %arg5[%c3_7, %c0_8] : memref<4x128xf32, #tpu.memory_space<vmem>>, vector<1x128xf32>
    %23 = vector.broadcast %21 : f32 to vector<1x128xf32>
    %24 = arith.mulf %23, %22 : vector<1x128xf32>
    %25 = arith.addf %19, %24 : vector<1x128xf32>
    %c0_9 = arith.constant 0 : index
    %c0_10 = arith.constant 0 : index
    %c0_11 = arith.constant 0 : index
    %26 = vector.load %arg3[%c0_9, %c0_10, %c0_11] : memref<1x256x128xbf16, #tpu.memory_space<vmem>>, vector<1x256x128xbf16>
    %27 = vector.shape_cast %26 : vector<1x256x128xbf16> to vector<256x128xbf16>
    %c0_12 = arith.constant 0 : index
    %c0_13 = arith.constant 0 : index
    %28 = vector.load %arg7[%c0_12, %c0_13] : memref<128x128xbf16, #tpu.memory_space<vmem>>, vector<128x128xbf16>
    %cst = arith.constant dense<0.000000e+00> : vector<256x128xf32>
    %29 = tpu.matmul %27, %28, %cst {dimension_numbers = #tpu.dot_dimension_numbers<[1], [0], [0], [1], [0, 0, 1, 1], [], []>} : vector<256x128xbf16>, vector<128x128xbf16>, vector<256x128xf32> -> vector<256x128xf32>
    %30 = vector.broadcast %25 : vector<1x128xf32> to vector<256x128xf32>
    %31 = arith.addf %29, %30 : vector<256x128xf32>
    %c0_14 = arith.constant 0 : index
    %c0_15 = arith.constant 0 : index
    %c0_16 = arith.constant 0 : index
    %32 = vector.load %arg6[%c0_14, %c0_15, %c0_16] : memref<1x256x128xf32, #tpu.memory_space<vmem>>, vector<1x256x128xf32>
    %33 = vector.shape_cast %32 : vector<1x256x128xf32> to vector<256x128xf32>
    %34 = vector.shape_cast %31 : vector<256x128xf32> to vector<1x256x128xf32>
    tpu.vector_store %arg6[%c0_14, %c0_15, %c0_16], %34 {strides = array<i32>} : memref<1x256x128xf32, #tpu.memory_space<vmem>>, vector<1x256x128xf32>,
    return
  }
  func.func @transform_0(%arg0: i32, %arg1: i32) -> (i32, i32) {
    %c0_i32 = arith.constant 0 : i32
    %c0_i32_0 = arith.constant 0 : i32
    %c0_i32_1 = arith.constant 0 : i32
    return %c0_i32, %c0_i32_0 : i32, i32
  }
  func.func @transform_1(%arg0: i32, %arg1: i32) -> (i32, i32, i32) {
    %c0_i32 = arith.constant 0 : i32
    %c0_i32_0 = arith.constant 0 : i32
    return %arg0, %arg1, %c0_i32 : i32, i32, i32
  }
  func.func @transform_2(%arg0: i32, %arg1: i32) -> (i32, i32, i32) {
    %c0_i32 = arith.constant 0 : i32
    %c0_i32_0 = arith.constant 0 : i32
    %c0_i32_1 = arith.constant 0 : i32
    %c0_i32_2 = arith.constant 0 : i32
    return %c0_i32, %c0_i32_0, %c0_i32_1 : i32, i32, i32
  }
  func.func @transform_3(%arg0: i32, %arg1: i32) -> (i32, i32) {
    %c0_i32 = arith.constant 0 : i32
    %c0_i32_0 = arith.constant 0 : i32
    %c0_i32_1 = arith.constant 0 : i32
    return %c0_i32, %c0_i32_0 : i32, i32
  }
  func.func @transform_4(%arg0: i32, %arg1: i32) -> (i32, i32, i32) {
    %c0_i32 = arith.constant 0 : i32
    %c0_i32_0 = arith.constant 0 : i32
    return %arg0, %arg1, %c0_i32 : i32, i32, i32
  }
}

</mosaic_0001>

<bundles_post_ra>
// kernel: tpu_custom_call.1
= control target key start
LH: loop header
LB: loop body
LE: loop exit
PB: predicated region body
PF: predicated region fallthrough
CT: control target
= control target key end

     0   :  { %9 = vsyncpa [#allocation6], 0  ;;  %s2076_s0 = inlined_call_operand.hbm [shape: f32[2,4], index: 0, kind: input, shape index: {}]   ;;  %s2077_s1 = inlined_call_operand.hbm [shape: bf16[2,256,128], index: 1, kind: input, shape index: {}]   ;;  %s2078_s2 = inlined_call_operand.hbm [shape: bf16[4,128,128], index: 2, kind: input, shape index: {}]   ;;  %s2079_s3 = inlined_call_operand.vmem [shape: f32[4,128], index: 3, kind: input, shape index: {}]   ;;  %s2080_s4 = inlined_call_operand.hbm [shape: f32[2,256,128], index: 4, kind: output, shape index: {}]  }
   0x1   :  { %10 = vsyncpa [#allocation4], 0 }
   0x2   :  { %12 = vsyncpa [#allocation4 + $0x1], 0 }
   0x3   :  { %13 = vsyncpa [#allocation9], 0 }
   0x4   :  { %14 = vsyncpa [#allocation5], 0 }
   0x5   :  { %16 = vsyncpa [#allocation5 + $0x1], 0  ;;  %s1602_s15 = smov 0   ;;  %s1604_s16 = smov 0  }
   0x6   :  { %s1606_s17 = smov 0   ;;  %s1608_s18 = smov 0  }
   0x7   :  { %s1610_s19 = smov 0   ;;  %s1612_s20 = smov 0  }
   0x8 LB: > { %s1020_s21 = sadd.s32 4294967295, %s1567_s20   ;;  %s1021_s22 = sadd.s32 4294967294, %s1567_s20   ;;  %s1567_s20 = sphi %s1612_s20, %s22_s20   ;;  %s1563_s19 = sphi %s1610_s19, %s2108_s19   ;;  %s1559_s18 = sphi %s1608_s18, %s2107_s18   ;;  %s1555_s17 = sphi %s1606_s17, %s2106_s17   ;;  %s1551_s16 = sphi %s1604_s16, %s2105_s16   ;;  %s1547_s15 = sphi %s1602_s15, %s2104_s15  }
   0x9   : > { %p71_p0 = scmp.ne.s32.totalorder %s1555_s17, %s1551_s16  ;;  %p72_p1 = scmp.eq.s32.totalorder %s1567_s20, 0 }
   0xa   : > { %p77_p2 = scmp.ne.s32.totalorder %s1551_s16, %s1547_s15  ;;  %p1640_p3 = scmp.eq.s32.totalorder %s1020_s21, 0 }
   0xb   : > { %p145_p4 = scmp.eq.s32.totalorder %s1020_s21, 1  ;;  %p73_p5 = por %p72_p1, %p71_p0 }
   0xc   : > { %s2087_s24 = scalar_select %p1640_p3, 1, 0 }
   0xd   : > { %p151_p6 = scmp.eq.s32.totalorder %s1021_s22, 1  ;;  %p1646_p7 = por %p1640_p3, %p77_p2 }
   0xe   : > { %p1650_p8 = por %p145_p4, %p71_p0  ;;  %p1022_p10 = scmp.ge.s32.totalorder %s1567_s20, 1 }
   0xf   : > { %s2088_s25 = scalar_select %p1646_p7, 1, 0 }
  0x10   : > { %s2089_s26 = scalar_select %p1650_p8, 1, 0 }
  0x11   : > { %p1654_p9 = por %p151_p6, %p77_p2  ;;  %p158_p11 = scmp.lt.s32.totalorder %s1567_s20, 3 }
  0x12   : > { %p1332_p1 = scmp.lt.s32.totalorder %s1567_s20, 2  ;;  %s1569_s30 = smov [#allocation8]  }
  0x13   : > { %s2090_s27 = scalar_select %p1654_p9, 1, 0 }
  0x14   : > { %p1661_p13 = pnand %p1022_p10, %p158_p11  ;;  %p1668_p7 = pnand %p1332_p1, %p73_p5 }
  0x15   : > { %s179_s5 = sshll.u32 %s1569_s30, 4  ;;  %p2093_p0 = scmp.ne.s32.totalorder %s2087_s24, 0  ;;  %s1678_s5 = int_to_ptr.vmem [resolvable:$true] %s179_s5 }
  0x16   : > { %s2091_s28 = scalar_select %p1661_p13, 1, 0 }
  0x17   : > { %p1315_p3 = pneg %p1661_p13  ;;  %s1406_s9 = scalar_lea.hbm %s2076_s0, 32 }
  0x18   : > { %p1407_p4 = scmp.ne.s32.totalorder %s2076_s0, %s1406_s9  ;;  %p1413_p10 = scmp.lt.u32.totalorder %s1406_s9, %s2076_s0 }
  0x19   : > { %p1674_p2 = pnand %p1315_p3, %p2093_p0 }
  0x1b   : > { %p1408_p5 = pneg %p1674_p2 }
  0x1d   : > { %p1409_p3 = pnand %p1408_p5, %p1407_p4 }
  0x1f   : > { %p1410_p6 = pneg %p1409_p3 }
  0x21   : > { %p1415_p11 = pnand %p1413_p10, %p1410_p6 }
  0x23   : > { %1418 = shalt.err (!%p1415_p11)
}
  0x24   : > { %s1570_s14 = smov [#allocation3]   ;;  %s1419_s8 = scalar_lea.hbm %s2078_s2, 4096 }
  0x25   : > { %1318 = dma.hbm_to_smem (!%p1674_p2), %s2076_s0, 32, %s1570_s14, [#allocation6]  }
  0x26   : > { %p1420_p1 = scmp.ne.s32.totalorder %s2078_s2, %s1419_s8  ;;  %p1426_p3 = scmp.lt.u32.totalorder %s1419_s8, %s2078_s2 }
  0x28   : > { %p1422_p0 = pnand %p1420_p1, %p1408_p5 }
  0x2a   : > { %p1423_p4 = pneg %p1422_p0 }
  0x2c   : > { %p1428_p6 = pnand %p1426_p3, %p1423_p4 }
  0x2e   : > { %1431 = shalt.err (!%p1428_p6)
}
  0x2f   : > { %s1432_s13 = scalar_lea.vmem %s1678_s5, 4096  ;;  %p1440_p9 = scmp.lt.s32.totalorder %s1678_s5, %s1678_s5 }
  0x30   : > { %p1433_p10 = scmp.ne.s32.totalorder %s1678_s5, %s1432_s13  ;;  %p1441_p1 = scmp.lt.s32.totalorder %s1432_s13, %s1432_s13 }
  0x32   : > { %p1435_p11 = pnand %p1433_p10, %p1408_p5  ;;  %p1442_p0 = por %p1441_p1, %p1440_p9 }
  0x34   : > { %p1436_p12 = pneg %p1435_p11 }
  0x36   : > { %p1443_p8 = pnand %p1442_p0, %p1436_p12 }
  0x38   : > { %1446 = shalt.err (!%p1443_p8)
}
  0x39   : > { %s2085_s14 = smov 64   ;;  %s1572_s21 = smov 4  }
  0x3a   : > { %1321 = dma.hbm_to_vmem [thread:$0]  (!%p1674_p2), %s2078_s2, 4096, %s1678_s5, [#allocation9], %s2085_s14, %s2085_s14, %s1572_s21  }
  0x3b   : > { %s34_s7 = sadd.s32 1, %s1563_s19  ;;  %s196_s8 = sand.u32 1, %s1555_s17  }
  0x3c   : > { %p36_p8 = scmp.ge.s32.totalorder %s34_s7, 2  ;;  %s1026_s10 = sshll.u32 %s196_s8, 7 }
  0x3d   : > { %s1057_s11 = sshll.u32 %s1563_s19, 11  ;;  %s200_s13 = scalar_lea.vmem [#allocation7], %s1026_s10 }
  0x3e   : > { %s2110_s7 = smov (%p36_p8, %s34_s7), 0  ;;  %s1735_s6 = scalar_lea.hbm %s2077_s1, %s1057_s11 }
  0x3f   : > { %s59_s5 = ssub.s32 %s1563_s19, %s2110_s7  ;;  %s209_s22 = sshll.u32 %s200_s13, 4  ;;  %s1743_s22 = int_to_ptr.vmem [resolvable:$true] %s209_s22 }
  0x40   : > { %p1739_p9 = scmp.eq.s32.totalorder %s59_s5, 0  ;;  %s1745_s23 = scalar_lea.sflag [#allocation4], %s196_s8 }
  0x41   : > { %s1447_s14 = scalar_lea.hbm %s1735_s6, 2048  ;;  %p1449_p2 = pneg %p1668_p7 }
  0x42   : > { %p1448_p12 = scmp.ne.s32.totalorder %s1735_s6, %s1447_s14  ;;  %s1452_s10 = scalar_lea.hbm %s2077_s1, 4096 }
  0x43   : > { %p1453_p3 = scmp.lt.u32.totalorder %s1735_s6, %s2077_s1  ;;  %p1454_p6 = scmp.lt.u32.totalorder %s1452_s10, %s1447_s14 }
  0x44   : > { %p1450_p5 = pnand %p1449_p2, %p1448_p12  ;;  %p1456_p11 = scmp.lt.u32.totalorder %s1447_s14, %s1735_s6 }
  0x45   : > { %p1455_p10 = por %p1454_p6, %p1453_p3 }
  0x46   : > { %p1451_p4 = pneg %p1450_p5 }
  0x47   : > { %p1457_p1 = por %p1456_p11, %p1455_p10 }
  0x49   : > { %p1458_p0 = pnand %p1457_p1, %p1451_p4 }
  0x4b   : > { %1461 = shalt.err (!%p1458_p0)
}
  0x4c   : > { %s1462_s8 = scalar_lea.vmem %s1743_s22, 2048  ;;  %s1573_s13 = smov [#allocation7]  }
  0x4d   : > { %p1463_p8 = scmp.ne.s32.totalorder %s1743_s22, %s1462_s8  ;;  %s1467_s11 = sshll.u32 %s1573_s13, 4  ;;  %s1468_s11 = int_to_ptr.vmem [resolvable:$false] %s1467_s11 }
  0x4e   : > { %s1469_s9 = scalar_lea.vmem %s1468_s11, 4096  ;;  %p1470_p13 = scmp.lt.s32.totalorder %s1743_s22, %s1468_s11 }
  0x4f   : > { %p1465_p12 = pnand %p1463_p8, %p1449_p2  ;;  %p1471_p3 = scmp.lt.s32.totalorder %s1469_s9, %s1462_s8 }
  0x51   : > { %p1466_p5 = pneg %p1465_p12  ;;  %p1472_p6 = por %p1471_p3, %p1470_p13 }
  0x53   : > { %p1473_p10 = pnand %p1472_p6, %p1466_p5 }
  0x55   : > { %1476 = shalt.err (!%p1473_p10)
}
  0x56   : > { %s2096_s14 = smov 64   ;;  %s2097_s10 = sadd.s32 1, %s1555_s17 }
  0x57   : > { %1325 = dma.hbm_to_vmem [thread:$0]  (!%p1668_p7), %s1735_s6, 2048, %s1743_s22, %s1745_s23, %s2096_s14, %s2096_s14, %s1572_s21  }
  0x58   : > { %s1781_s12 = scalar_select %p1739_p9, %s1555_s17, %s2097_s10  }
  0x59   : > { %p2098_p13 = scmp.ne.s32.totalorder %s2091_s28, 0 }
  0x5a   : > { %p2099_p2 = scmp.ne.s32.totalorder (!%p2098_p13), %s2087_s24, 0 }
  0x5b   : > { %221 = sbr.rel (%p2098_p13) target bundleno = 425 (0x1a9), region = 36 }
  0x62   : > { %1530 = dma.done.wait (%p2099_p2), [#allocation6], 32  }
  0x63   : > { %1532 = vsyncadd (%p2099_p2), [#allocation6], 4294967264  ;;  %s1790_s29 = sand.u32 1, %s1551_s16   ;;  %p2100_p7 = scmp.ne.s32.totalorder %s2088_s25, 0 }
  0x64   : > { %s1031_s23 = sshll.u32 %s1790_s29, 7  ;;  %s228_s21 = scalar_lea.sflag [#allocation4], %s1790_s29 }
  0x65   : > { %s1794_s6 = scalar_lea.vmem [#allocation7], %s1031_s23 }
  0x66   : > { %1534 = dma.done.wait (%p2100_p7), %s228_s21, 2048  }
  0x67   : > { %1536 = vsyncadd (%p2100_p7), %s228_s21, 4294965248 }
  0x68   : > { %1538 = dma.done.wait (%p2099_p2), [#allocation9], 4096  }
  0x69   : > { %1540 = vsyncadd (%p2099_p2), [#allocation9], 4294963200 }
  0x6a   : > { %240 = sfence }
  0x6b   : > { %s1805_s28 = sshll.u32 %s1559_s18, 7  ;;  %v1060_v0 = vld [vmem:[#allocation8] sm:$0xff]   ;;  %v1187_v4 = vld [vmem:[#allocation8 + $0x8] sm:$0xff]   ;;  %v1822_v19 = vld [vmem:[#allocation8 + $0x10] sm:$0xff]   ;;  %p2101_p4 = scmp.ne.s32.totalorder %s2089_s26, 0 }
  0x6c   : > { %v1092_v1 = vld [vmem:[#allocation8 + $0x40] sm:$0xff]   ;;  %s1808_s22 = sld [smem:[#allocation3 + %s1805_s28]]  ;;  %s319_s25 = sadd.s32 1, %s1805_s28  ;;  %v1061_v5 = vunpack.c.l.bf16 %v1060_v0  ;;  %v1062_v6 = vunpack.c.h.bf16 %v1060_v0  ;;  %v1194_v12 = vld [vmem:[#allocation8 + $0x48] sm:$0xff]   ;;  %v1065_v14 = vunpack.c.l.bf16 %v1187_v4  ;;  %v1066_v15 = vunpack.c.h.bf16 %v1187_v4  ;;  %v1828_v24 = vld [vmem:[#allocation8 + $0x50] sm:$0xff]  }
  0x6d   : > { %v1124_v2 = vld [vmem:[#allocation8 + $0x80] sm:$0xff]   ;;  %s1811_s24 = sld [smem:[#allocation3 + %s319_s25]]  ;;  %v1093_v7 = vunpack.c.l.bf16 %v1092_v1  ;;  %s387_s30 = sadd.s32 2, %s1805_s28  ;;  %v1094_v8 = vunpack.c.h.bf16 %v1092_v1  ;;  %v1097_v16 = vunpack.c.l.bf16 %v1194_v12  ;;  %v1201_v17 = vld [vmem:[#allocation8 + $0x88] sm:$0xff]   ;;  %v1098_v20 = vunpack.c.h.bf16 %v1194_v12  ;;  %v1830_v25 = vld [vmem:[#allocation8 + $0x90] sm:$0xff]  }
  0x6e   : > { %v1156_v3 = vld [vmem:[#allocation8 + $0xc0] sm:$0xff]   ;;  %s1814_s5 = sld [smem:[#allocation3 + %s387_s30]]  ;;  %v1125_v9 = vunpack.c.l.bf16 %v1124_v2  ;;  %v1126_v10 = vunpack.c.h.bf16 %v1124_v2  ;;  %s455_s8 = sadd.s32 3, %s1805_s28  ;;  %v1208_v18 = vld [vmem:[#allocation8 + $0xc8] sm:$0xff]   ;;  %v1129_v21 = vunpack.c.l.bf16 %v1201_v17  ;;  %v1130_v22 = vunpack.c.h.bf16 %v1201_v17  ;;  %v541_v41 = vld [vmem:[%s2079_s3] sm:$0x1] }
  0x6f   : > { %v1157_v11 = vunpack.c.l.bf16 %v1156_v3  ;;  %s1817_s13 = sld [smem:[#allocation3 + %s455_s8]]  ;;  %v1158_v13 = vunpack.c.h.bf16 %v1156_v3  ;;  %v1161_v23 = vunpack.c.l.bf16 %v1208_v18  ;;  %v1162_v26 = vunpack.c.h.bf16 %v1208_v18  ;;  %v546_v47 = vld [vmem:[%s2079_s3 + $0x1] sm:$0x1]  ;;  %v552_v48 = vld [vmem:[%s2079_s3 + $0x2] sm:$0x1]  ;;  %v1390_v62 = vld [vmem:[%s1794_s6] sm:$0xff]  }
  0x70   : > { %s1820_s11 = sld [smem:[#allocation3 + %s1805_s28]]  ;;  %v1069_v27 = vunpack.c.l.bf16 %v1822_v19  ;;  %v1070_v28 = vunpack.c.h.bf16 %v1822_v19  ;;  %v1101_v29 = vunpack.c.l.bf16 %v1828_v24  ;;  %v1102_v31 = vunpack.c.h.bf16 %v1828_v24  ;;  %v558_v53 = vld [vmem:[%s2079_s3 + $0x3] sm:$0x1]  ;;  %v1391_v3 = vld [vmem:[%s1794_s6 + $0x40] sm:$0xff]   ;;  %1255 = vmatprep.mubr.bf16.mxu0 %v1390_v62  ;;  %v1209_v12 = vld [vmem:[#allocation8 + $0xd0] sm:$0xff]   ;;  %s1574_s21 = smov [#allocation10]  }
  0x71   : > { %s1824_s9 = sld [smem:[#allocation3 + %s319_s25]]  ;;  %v1133_v32 = vunpack.c.l.bf16 %v1830_v25  ;;  %v1134_v33 = vunpack.c.h.bf16 %v1830_v25  ;;  %1271 = vmatprep.mubr.bf16.mxu1 %v1391_v3  ;;  %v1165_v25 = vunpack.c.l.bf16 %v1209_v12  ;;  %v1204_v62 = vld [vmem:[#allocation8 + $0xa0] sm:$0xff]   ;;  %s1481_s28 = sshll.u32 %s1574_s21, 4  ;;  %s1482_s28 = int_to_ptr.vmem [resolvable:$false] %s1481_s28 }
  0x72   : > { %s1826_s14 = sld [smem:[#allocation3 + %s387_s30]]  ;;  %v1838_v30 = vstv %s1808_s22  ;;  %v1211_v3 = vld [vmem:[#allocation8 + $0xe0] sm:$0xff]   ;;  %s1483_s22 = scalar_lea.vmem %s1482_s28, 8192 }
  0x73   : > { %s1832_s10 = sld [smem:[#allocation3 + %s455_s8]]  ;;  %v303_v34 = vmul.f32 %v1061_v5, %v1838_v30  ;;  %v304_v35 = vmul.f32 %v1062_v6, %v1838_v30  ;;  %v1846_v36 = vstv %s1811_s24  ;;  %v305_v37 = vmul.f32 %v1065_v14, %v1838_v30  ;;  %s1033_s8 = sshll.u32 %s1790_s29, 8 }
  0x74   : > { %v355_v38 = vmul.f32 %v1093_v7, %v1846_v36  ;;  %v356_v39 = vmul.f32 %v1094_v8, %v1846_v36  ;;  %v1852_v40 = vstv %s1814_s5  ;;  %v306_v42 = vmul.f32 %v1066_v15, %v1838_v30 }
  0x75   : > { %v423_v43 = vmul.f32 %v1125_v9, %v1852_v40  ;;  %v424_v44 = vmul.f32 %v1126_v10, %v1852_v40  ;;  %v1861_v45 = vstv %s1817_s13  ;;  %v357_v0 = vmul.f32 %v1097_v16, %v1846_v36  ;;  %s1058_s13 = sshll.u32 %s1559_s18, 12 }
  0x76   : > { %v542_v46 = vstv %s1820_s11  ;;  %v371_v49 = vadd.f32 %v355_v38, %v303_v34  ;;  %v372_v50 = vadd.f32 %v356_v39, %v304_v35  ;;  %v491_v51 = vmul.f32 %v1157_v11, %v1861_v45  ;;  %v1196_v35 = vld [vmem:[#allocation8 + $0x58] sm:$0xff]  }
  0x77   : > { %v492_v52 = vmul.f32 %v1158_v13, %v1861_v45  ;;  %v543_v54 = vmul.f32 %v542_v46, %v541_v41  ;;  %v547_v55 = vstv %s1824_s9  ;;  %v358_v1 = vmul.f32 %v1098_v20, %v1846_v36  ;;  %v1203_v38 = vld [vmem:[#allocation8 + $0x98] sm:$0xff]  }
  0x78   : > { %v553_v56 = vstv %s1826_s14  ;;  %v439_v58 = vadd.f32 %v423_v43, %v371_v49  ;;  %v440_v59 = vadd.f32 %v424_v44, %v372_v50  ;;  %v548_v60 = vmul.f32 %v547_v55, %v546_v47  ;;  %v1210_v43 = vld [vmem:[#allocation8 + $0xd8] sm:$0xff]   ;;  %s2017_s14 = scalar_lea.hbm %s2080_s4, %s1058_s13 }
  0x79   : > { %v559_v57 = vstv %s1832_s10  ;;  %v554_v61 = vmul.f32 %v553_v56, %v552_v48  ;;  %v425_v2 = vmul.f32 %v1129_v21, %v1852_v40  ;;  %v426_v7 = vmul.f32 %v1130_v22, %v1852_v40  ;;  %v1189_v21 = vld [vmem:[#allocation8 + $0x18] sm:$0xff]   ;;  %v1190_v48 = vld [vmem:[#allocation8 + $0x20] sm:$0xff]   ;;  %s896_s10 = scalar_lea.sflag [#allocation5], %s1790_s29 }
  0x7a   : > { %v560_v63 = vmul.f32 %v559_v57, %v558_v53  ;;  %v507_v4 = vadd.f32 %v491_v51, %v439_v58  ;;  %v508_v5 = vadd.f32 %v492_v52, %v440_v59  ;;  %v549_v6 = vadd.f32 %v548_v60, %v543_v54  ;;  %v1197_v57 = vld [vmem:[#allocation8 + $0x60] sm:$0xff]  }
  0x7b   : > { %v373_v8 = vadd.f32 %v357_v0, %v305_v37  ;;  %v374_v9 = vadd.f32 %v358_v1, %v306_v42  ;;  %v493_v10 = vmul.f32 %v1161_v23, %v1861_v45  ;;  %v494_v11 = vmul.f32 %v1162_v26, %v1861_v45 }
  0x7c   : > { %v523_v13 = vpack.c.bf16 %v508_v5, %v507_v4  ;;  %v555_v14 = vadd.f32 %v554_v61, %v549_v6  ;;  %v307_v15 = vmul.f32 %v1069_v27, %v1838_v30  ;;  %v308_v16 = vmul.f32 %v1070_v28, %v1838_v30 }
  0x7d   : > { %v441_v17 = vadd.f32 %v425_v2, %v373_v8  ;;  %v442_v18 = vadd.f32 %v426_v7, %v374_v9  ;;  %v359_v19 = vmul.f32 %v1101_v29, %v1846_v36  ;;  %v360_v20 = vmul.f32 %v1102_v31, %v1846_v36 }
  0x7e   : > { %v1890_v22 = vadd.f32 %v560_v63, %v555_v14  ;;  %1239 = vmatprep.subr.bf16.mxu0 %v523_v13  ;;  %1287 = vmatprep.subr.bf16.mxu1 %v523_v13  ;;  %v427_v23 = vmul.f32 %v1133_v32, %v1852_v40  ;;  %v428_v24 = vmul.f32 %v1134_v33, %v1852_v40  ;;  %v1166_v34 = vunpack.c.h.bf16 %v1209_v12 }
  0x7f   : > { %1240 = vmatpush3.bf16.msra.mxu0 %v523_v13  ;;  %1295 = vmatpush3.bf16.msra.mxu1 %v523_v13  ;;  %v509_v26 = vadd.f32 %v493_v10, %v441_v17  ;;  %v510_v27 = vadd.f32 %v494_v11, %v442_v18  ;;  %v375_v28 = vadd.f32 %v359_v19, %v307_v15  ;;  %v1073_v37 = vunpack.c.l.bf16 %v1189_v21 }
  0x80   : > { %v376_v29 = vadd.f32 %v360_v20, %v308_v16  ;;  %v495_v31 = vmul.f32 %v1165_v25, %v1861_v45  ;;  %v496_v42 = vmul.f32 %v1166_v34, %v1861_v45  ;;  %v1074_v32 = vunpack.c.h.bf16 %v1189_v21  ;;  %v1191_v16 = vld [vmem:[#allocation8 + $0x28] sm:$0xff]  }
  0x81   : > { %v524_v39 = vpack.c.bf16 %v510_v27, %v509_v26  ;;  %v443_v41 = vadd.f32 %v427_v23, %v375_v28  ;;  %v309_v44 = vmul.f32 %v1073_v37, %v1838_v30  ;;  %v1105_v46 = vunpack.c.l.bf16 %v1196_v35  ;;  %v1198_v21 = vld [vmem:[#allocation8 + $0x68] sm:$0xff]  }
  0x82   : > { %v444_v33 = vadd.f32 %v428_v24, %v376_v29  ;;  %v1106_v47 = vunpack.c.h.bf16 %v1196_v35  ;;  %v310_v50 = vmul.f32 %v1074_v32, %v1838_v30  ;;  %v1137_v51 = vunpack.c.l.bf16 %v1203_v38  ;;  %v1205_v27 = vld [vmem:[#allocation8 + $0xa8] sm:$0xff]  }
  0x83   : > { %1241 = vmatprep.subr.bf16.mxu0 %v524_v39  ;;  %1288 = vmatprep.subr.bf16.mxu1 %v524_v39  ;;  %v511_v49 = vadd.f32 %v495_v31, %v443_v41  ;;  %v1138_v52 = vunpack.c.h.bf16 %v1203_v38  ;;  %v361_v54 = vmul.f32 %v1105_v46, %v1846_v36  ;;  %v1169_v56 = vunpack.c.l.bf16 %v1210_v43  ;;  %v1212_v41 = vld [vmem:[#allocation8 + $0xe8] sm:$0xff]  }
  0x84   : > { %1242 = vmatpush3.bf16.msra.mxu0 %v524_v39  ;;  %1296 = vmatpush3.bf16.msra.mxu1 %v524_v39  ;;  %v512_v53 = vadd.f32 %v496_v42, %v444_v33  ;;  %v362_v55 = vmul.f32 %v1106_v47, %v1846_v36  ;;  %v429_v58 = vmul.f32 %v1137_v51, %v1852_v40  ;;  %v1170_v60 = vunpack.c.h.bf16 %v1210_v43 }
  0x85   : > { %v430_v59 = vmul.f32 %v1138_v52, %v1852_v40  ;;  %v1077_v61 = vunpack.c.l.bf16 %v1190_v48  ;;  %v377_v0 = vadd.f32 %v361_v54, %v309_v44  ;;  %v497_v2 = vmul.f32 %v1169_v56, %v1861_v45  ;;  %v1192_v44 = vld [vmem:[#allocation8 + $0x30] sm:$0xff]  }
  0x86   : > { %v525_v63 = vpack.c.bf16 %v512_v53, %v511_v49  ;;  %v378_v1 = vadd.f32 %v362_v55, %v310_v50  ;;  %v498_v4 = vmul.f32 %v1170_v60, %v1861_v45  ;;  %v1078_v5 = vunpack.c.h.bf16 %v1190_v48  ;;  %v1199_v54 = vld [vmem:[#allocation8 + $0x70] sm:$0xff]  }
  0x87   : > { %v311_v6 = vmul.f32 %v1077_v61, %v1838_v30  ;;  %v1109_v7 = vunpack.c.l.bf16 %v1197_v57  ;;  %v445_v8 = vadd.f32 %v429_v58, %v377_v0  ;;  %v1110_v10 = vunpack.c.h.bf16 %v1197_v57  ;;  %v1213_v0 = vld [vmem:[#allocation8 + $0xf0] sm:$0xff]  }
  0x88   : > { %1243 = vmatprep.subr.bf16.mxu0 %v525_v63  ;;  %1289 = vmatprep.subr.bf16.mxu1 %v525_v63  ;;  %v446_v9 = vadd.f32 %v430_v59, %v378_v1  ;;  %v1141_v11 = vunpack.c.l.bf16 %v1204_v62  ;;  %v312_v12 = vmul.f32 %v1078_v5, %v1838_v30  ;;  %v1142_v14 = vunpack.c.h.bf16 %v1204_v62  ;;  %v1206_v59 = vld [vmem:[#allocation8 + $0xb0] sm:$0xff]  }
  0x89   : > { %1244 = vmatpush3.bf16.msra.mxu0 %v525_v63  ;;  %1297 = vmatpush3.bf16.msra.mxu1 %v525_v63  ;;  %v363_v13 = vmul.f32 %v1109_v7, %v1846_v36  ;;  %v1173_v15 = vunpack.c.l.bf16 %v1211_v3  ;;  %v513_v17 = vadd.f32 %v497_v2, %v445_v8  ;;  %v364_v19 = vmul.f32 %v1110_v10, %v1846_v36 }
  0x8a   : > { %v514_v18 = vadd.f32 %v498_v4, %v446_v9  ;;  %v431_v20 = vmul.f32 %v1141_v11, %v1852_v40  ;;  %v432_v24 = vmul.f32 %v1142_v14, %v1852_v40  ;;  %v1174_v25 = vunpack.c.h.bf16 %v1211_v3  ;;  %v1193_v9 = vld [vmem:[#allocation8 + $0x38] sm:$0xff]  }
  0x8b   : > { %v379_v23 = vadd.f32 %v363_v13, %v311_v6  ;;  %v499_v26 = vmul.f32 %v1173_v15, %v1861_v45  ;;  %v380_v34 = vadd.f32 %v364_v19, %v312_v12  ;;  %v1081_v35 = vunpack.c.l.bf16 %v1191_v16  ;;  %v1200_v14 = vld [vmem:[#allocation8 + $0x78] sm:$0xff]  }
  0x8c   : > { %v526_v28 = vpack.c.bf16 %v514_v18, %v513_v17  ;;  %v1082_v29 = vunpack.c.h.bf16 %v1191_v16  ;;  %v500_v37 = vmul.f32 %v1174_v25, %v1861_v45  ;;  %v1113_v38 = vunpack.c.l.bf16 %v1198_v21  ;;  %v1207_v19 = vld [vmem:[#allocation8 + $0xb8] sm:$0xff]  }
  0x8d   : > { %v447_v31 = vadd.f32 %v431_v20, %v379_v23  ;;  %v1114_v39 = vunpack.c.h.bf16 %v1198_v21  ;;  %v448_v42 = vadd.f32 %v432_v24, %v380_v34  ;;  %v313_v32 = vmul.f32 %v1081_v35, %v1838_v30  ;;  %v1214_v34 = vld [vmem:[#allocation8 + $0xf8] sm:$0xff]  }
  0x8e   : > { %1245 = vmatprep.subr.bf16.mxu0 %v526_v28  ;;  %1290 = vmatprep.subr.bf16.mxu1 %v526_v28  ;;  %v314_v43 = vmul.f32 %v1082_v29, %v1838_v30  ;;  %v1145_v33 = vunpack.c.l.bf16 %v1205_v27  ;;  %v365_v47 = vmul.f32 %v1113_v38, %v1846_v36  ;;  %v1146_v49 = vunpack.c.h.bf16 %v1205_v27 }
  0x8f   : > { %1246 = vmatpush3.bf16.msra.mxu0 %v526_v28  ;;  %1298 = vmatpush3.bf16.msra.mxu1 %v526_v28  ;;  %v515_v46 = vadd.f32 %v499_v26, %v447_v31  ;;  %v366_v48 = vmul.f32 %v1114_v39, %v1846_v36  ;;  %v516_v50 = vadd.f32 %v500_v37, %v448_v42  ;;  %v1177_v52 = vunpack.c.l.bf16 %v1212_v41 }
  0x90   : > { %v433_v51 = vmul.f32 %v1145_v33, %v1852_v40  ;;  %v1178_v53 = vunpack.c.h.bf16 %v1212_v41  ;;  %v381_v55 = vadd.f32 %v365_v47, %v313_v32  ;;  %v434_v57 = vmul.f32 %v1146_v49, %v1852_v40 }
  0x91   : > { %v382_v56 = vadd.f32 %v366_v48, %v314_v43  ;;  %v1085_v58 = vunpack.c.l.bf16 %v1192_v44  ;;  %v527_v60 = vpack.c.bf16 %v516_v50, %v515_v46  ;;  %v501_v61 = vmul.f32 %v1177_v52, %v1861_v45 }
  0x92   : > { %v502_v62 = vmul.f32 %v1178_v53, %v1861_v45  ;;  %v1086_v63 = vunpack.c.h.bf16 %v1192_v44  ;;  %v449_v1 = vadd.f32 %v433_v51, %v381_v55  ;;  %v1117_v4 = vunpack.c.l.bf16 %v1199_v54 }
  0x93   : > { %v450_v2 = vadd.f32 %v434_v57, %v382_v56  ;;  %v315_v3 = vmul.f32 %v1085_v58, %v1838_v30  ;;  %1247 = vmatprep.subr.bf16.mxu0 %v527_v60  ;;  %1291 = vmatprep.subr.bf16.mxu1 %v527_v60  ;;  %v1118_v6 = vunpack.c.h.bf16 %v1199_v54  ;;  %v1149_v7 = vunpack.c.l.bf16 %v1206_v59  ;;  %v1392_v56 = vld [vmem:[%s1794_s6 + $0x8] sm:$0xff]   ;;  %v1395_v58 = vld [vmem:[%s1794_s6 + $0x50] sm:$0xff]  }
  0x94   : > { %v316_v5 = vmul.f32 %v1086_v63, %v1838_v30  ;;  %v1150_v8 = vunpack.c.h.bf16 %v1206_v59  ;;  %1248 = vmatpush3.bf16.msra.mxu0 %v527_v60  ;;  %1299 = vmatpush3.bf16.msra.mxu1 %v527_v60  ;;  %v517_v10 = vadd.f32 %v501_v61, %v449_v1  ;;  %v367_v12 = vmul.f32 %v1117_v4, %v1846_v36  ;;  %v1393_v57 = vld [vmem:[%s1794_s6 + $0x48] sm:$0xff]   ;;  %v1396_v59 = vld [vmem:[%s1794_s6 + $0x18] sm:$0xff]   ;;  %v1398_v61 = vld [vmem:[%s1794_s6 + $0x20] sm:$0xff]  }
  0x95   : > { %v518_v11 = vadd.f32 %v502_v62, %v450_v2  ;;  %v1181_v13 = vunpack.c.l.bf16 %v1213_v0  ;;  %v368_v15 = vmul.f32 %v1118_v6, %v1846_v36  ;;  %v435_v16 = vmul.f32 %v1149_v7, %v1852_v40  ;;  %v1397_v60 = vld [vmem:[%s1794_s6 + $0x58] sm:$0xff]   ;;  %v1399_v62 = vld [vmem:[%s1794_s6 + $0x60] sm:$0xff]   ;;  %v1400_v63 = vld [vmem:[%s1794_s6 + $0x28] sm:$0xff]  }
  0x96   : > { %v436_v17 = vmul.f32 %v1150_v8, %v1852_v40  ;;  %v1182_v18 = vunpack.c.h.bf16 %v1213_v0  ;;  %v383_v21 = vadd.f32 %v367_v12, %v315_v3  ;;  %v1089_v24 = vunpack.c.l.bf16 %v1193_v9  ;;  %v1401_v0 = vld [vmem:[%s1794_s6 + $0x68] sm:$0xff]   ;;  %v1402_v1 = vld [vmem:[%s1794_s6 + $0x30] sm:$0xff]   ;;  %v1404_v3 = vld [vmem:[%s1794_s6 + $0x38] sm:$0xff]  }
  0x97   : > { %v528_v20 = vpack.c.bf16 %v518_v11, %v517_v10  ;;  %v503_v23 = vmul.f32 %v1181_v13, %v1861_v45  ;;  %v384_v25 = vadd.f32 %v368_v15, %v316_v5  ;;  %v1090_v27 = vunpack.c.h.bf16 %v1193_v9  ;;  %v1403_v2 = vld [vmem:[%s1794_s6 + $0x70] sm:$0xff]   ;;  %v1405_v4 = vld [vmem:[%s1794_s6 + $0x78] sm:$0xff]  }
  0x98   : > { %v504_v26 = vmul.f32 %v1182_v18, %v1861_v45  ;;  %v1121_v28 = vunpack.c.l.bf16 %v1200_v14  ;;  %v451_v35 = vadd.f32 %v435_v16, %v383_v21  ;;  %v317_v29 = vmul.f32 %v1089_v24, %v1838_v30 }
  0x99   : > { %1249 = vmatprep.subr.bf16.mxu0 %v528_v20  ;;  %1292 = vmatprep.subr.bf16.mxu1 %v528_v20  ;;  %v1122_v31 = vunpack.c.h.bf16 %v1200_v14  ;;  %v1153_v37 = vunpack.c.l.bf16 %v1207_v19  ;;  %v452_v38 = vadd.f32 %v436_v17, %v384_v25  ;;  %v318_v39 = vmul.f32 %v1090_v27, %v1838_v30 }
  0x9a   : > { %1250 = vmatpush3.bf16.msra.mxu0 %v528_v20  ;;  %1300 = vmatpush3.bf16.msra.mxu1 %v528_v20  ;;  %v369_v41 = vmul.f32 %v1121_v28, %v1846_v36  ;;  %v1154_v42 = vunpack.c.h.bf16 %v1207_v19  ;;  %v519_v32 = vadd.f32 %v503_v23, %v451_v35  ;;  %v1185_v44 = vunpack.c.l.bf16 %v1214_v34 }
  0x9b   : > { %v370_v43 = vmul.f32 %v1122_v31, %v1846_v36  ;;  %v437_v33 = vmul.f32 %v1153_v37, %v1852_v40  ;;  %v520_v46 = vadd.f32 %v504_v26, %v452_v38  ;;  %v1186_v49 = vunpack.c.h.bf16 %v1214_v34 }
  0x9c   : > { %v385_v47 = vadd.f32 %v369_v41, %v317_v29  ;;  %v438_v48 = vmul.f32 %v1154_v42, %v1852_v40  ;;  %v505_v51 = vmul.f32 %v1185_v44, %v1861_v45  ;;  %v602_v5 = vlaneseq }
  0x9d   : > { %v386_v50 = vadd.f32 %v370_v43, %v318_v39  ;;  %v529_v30 = vpack.c.bf16 %v520_v46, %v519_v32  ;;  %v506_v53 = vmul.f32 %v1186_v49, %v1861_v45  ;;  %v1394_v45 = vld [vmem:[%s1794_s6 + $0x10] sm:$0xff]   ;;  %s1958_s6 = scalar_lea.vmem [#allocation10], %s1033_s8 }
  0x9e   : > { %v453_v52 = vadd.f32 %v437_v33, %v385_v47  ;;  %v603_v6 = vshrl.u32 %v602_v5, 7  ;;  %s911_s11 = sshll.u32 %s1958_s6, 4  ;;  %s2019_s11 = int_to_ptr.vmem [resolvable:$true] %s911_s11 }
  0x9f   : > { %v454_v36 = vadd.f32 %v438_v48, %v386_v50  ;;  %1251 = vmatprep.subr.bf16.mxu0 %v529_v30  ;;  %1293 = vmatprep.subr.bf16.mxu1 %v529_v30  ;;  %s1477_s23 = scalar_lea.vmem %s2019_s11, 4096  ;;  %p1484_p0 = scmp.lt.s32.totalorder %s2019_s11, %s1482_s28 }
  0xa0   : > { %v521_v54 = vadd.f32 %v505_v51, %v453_v52  ;;  %1252 = vmatpush3.bf16.msra.mxu0 %v529_v30  ;;  %1301 = vmatpush3.bf16.msra.mxu1 %v529_v30  ;;  %v604_v7 = vsub.s32 0, %v603_v6  ;;  %p1478_p9 = scmp.ne.s32.totalorder %s2019_s11, %s1477_s23  ;;  %p1485_p8 = scmp.lt.s32.totalorder %s1483_s22, %s1477_s23 }
  0xa1   : > { %v522_v40 = vadd.f32 %v506_v53, %v454_v36 }
  0xa2   : > { %v1951_v8 = vrot.slane %v1890_v22, %v604_v7  ;;  %p1479_p11 = pnand %p1478_p9, %p2101_p4  ;;  %p1486_p12 = por %p1485_p8, %p1484_p0 }
  0xa3   : > { %v530_v55 = vpack.c.bf16 %v522_v40, %v521_v54 }
  0xa4   : > { %p1480_p1 = pneg %p1479_p11 }
  0xa5   : > { %1253 = vmatprep.subr.bf16.mxu0 %v530_v55  ;;  %1294 = vmatprep.subr.bf16.mxu1 %v530_v55 }
  0xa6   : > { %1254 = vmatpush3.bf16.msra.mxu0 %v530_v55  ;;  %1302 = vmatpush3.bf16.msra.mxu1 %v530_v55  ;;  %p1487_p5 = pnand %p1486_p12, %p1480_p1 }
  0xa9   : > { %1256 = vmatmul.mubr.bf16.vlgmr.msra.gmra.mrb[0].mxu0 %v1392_v56  ;;  %1272 = vmatmul.mubr.bf16.vlgmr.msra.gmra.mrb[0].mxu1 %v1393_v57 }
  0xaa   : > { %1259 = vmatprep.mubr.bf16.mxu0 %v1394_v45  ;;  %1275 = vmatprep.mubr.bf16.mxu1 %v1395_v58 }
  0xb1   : > { %1260 = vmatmul.mubr.bf16.gmra.mrb[4].mxu0 %v1396_v59  ;;  %1276 = vmatmul.mubr.bf16.gmra.mrb[4].mxu1 %v1397_v60 }
  0xb2   : > { %1263 = vmatprep.mubr.bf16.mxu0 %v1398_v61  ;;  %1279 = vmatprep.mubr.bf16.mxu1 %v1399_v62 }
  0xb9   : > { %1264 = vmatmul.mubr.bf16.gmra.mrb[8].mxu0 %v1400_v63  ;;  %1280 = vmatmul.mubr.bf16.gmra.mrb[8].mxu1 %v1401_v0 }
  0xba   : > { %1267 = vmatprep.mubr.bf16.mxu0 %v1402_v1  ;;  %1283 = vmatprep.mubr.bf16.mxu1 %v1403_v2 }
  0xc1   : > { %1268 = vmatmul.mubr.bf16.gmra.mrb[12].mxu0 %v1404_v3  ;;  %1284 = vmatmul.mubr.bf16.gmra.mrb[12].mxu1 %v1405_v4 }
 0x17c   : > { %v1257_v9 = vpop.f32.mrb[0].mxu0  ;;  %v1273_v10 = vpop.f32.mrb[0].mxu1 }
 0x17d   : > { %v745_v11 = vadd.f32 %v1257_v9, %v1951_v8  ;;  %v809_v12 = vadd.f32 %v1273_v10, %v1951_v8  ;;  %v736_v13 = vpop.f32.mrb[1].mxu0  ;;  %v800_v14 = vpop.f32.mrb[1].mxu1 }
 0x17e   : > { %v737_v15 = vadd.f32 %v736_v13, %v1951_v8  ;;  %v801_v16 = vadd.f32 %v800_v14, %v1951_v8  ;;  %v1258_v17 = vpop.f32.mrb[2].mxu0  ;;  %v1274_v18 = vpop.f32.mrb[2].mxu1 }
 0x17f   : > { %865 = vst [vmem:[%s1958_s6 + $0x10] sm:$0xff] %v745_v11  ;;  %881 = vst [vmem:[%s1958_s6 + $0x90] sm:$0xff] %v809_v12  ;;  %v748_v22 = vadd.f32 %v1258_v17, %v1951_v8  ;;  %v812_v19 = vadd.f32 %v1274_v18, %v1951_v8  ;;  %v739_v20 = vpop.f32.mrb[3].mxu0  ;;  %v803_v21 = vpop.f32.mrb[3].mxu1 }
 0x180   : > { %863 = vst [vmem:[%s1958_s6] sm:$0xff] %v737_v15  ;;  %879 = vst [vmem:[%s1958_s6 + $0x80] sm:$0xff] %v801_v16  ;;  %v740_v23 = vadd.f32 %v739_v20, %v1951_v8  ;;  %v804_v24 = vadd.f32 %v803_v21, %v1951_v8 }
 0x181   : > { %866 = vst [vmem:[%s1958_s6 + $0x18] sm:$0xff] %v748_v22  ;;  %882 = vst [vmem:[%s1958_s6 + $0x98] sm:$0xff] %v812_v19 }
 0x182   : > { %864 = vst [vmem:[%s1958_s6 + $0x8] sm:$0xff] %v740_v23  ;;  %880 = vst [vmem:[%s1958_s6 + $0x88] sm:$0xff] %v804_v24 }
 0x184   : > { %v1261_v25 = vpop.f32.mrb[4].mxu0  ;;  %v1277_v26 = vpop.f32.mrb[4].mxu1 }
 0x185   : > { %v761_v27 = vadd.f32 %v1261_v25, %v1951_v8  ;;  %v825_v28 = vadd.f32 %v1277_v26, %v1951_v8  ;;  %v752_v34 = vpop.f32.mrb[5].mxu0  ;;  %v816_v35 = vpop.f32.mrb[5].mxu1 }
 0x186   : > { %v753_v29 = vadd.f32 %v752_v34, %v1951_v8  ;;  %v817_v31 = vadd.f32 %v816_v35, %v1951_v8  ;;  %v1262_v37 = vpop.f32.mrb[6].mxu0  ;;  %v1278_v38 = vpop.f32.mrb[6].mxu1 }
 0x187   : > { %869 = vst [vmem:[%s1958_s6 + $0x30] sm:$0xff] %v761_v27  ;;  %885 = vst [vmem:[%s1958_s6 + $0xb0] sm:$0xff] %v825_v28  ;;  %v764_v39 = vadd.f32 %v1262_v37, %v1951_v8  ;;  %v828_v41 = vadd.f32 %v1278_v38, %v1951_v8  ;;  %v755_v42 = vpop.f32.mrb[7].mxu0  ;;  %v819_v32 = vpop.f32.mrb[7].mxu1 }
 0x188   : > { %867 = vst [vmem:[%s1958_s6 + $0x20] sm:$0xff] %v753_v29  ;;  %883 = vst [vmem:[%s1958_s6 + $0xa0] sm:$0xff] %v817_v31  ;;  %v756_v43 = vadd.f32 %v755_v42, %v1951_v8  ;;  %v820_v33 = vadd.f32 %v819_v32, %v1951_v8 }
 0x189   : > { %870 = vst [vmem:[%s1958_s6 + $0x38] sm:$0xff] %v764_v39  ;;  %886 = vst [vmem:[%s1958_s6 + $0xb8] sm:$0xff] %v828_v41 }
 0x18a   : > { %868 = vst [vmem:[%s1958_s6 + $0x28] sm:$0xff] %v756_v43  ;;  %884 = vst [vmem:[%s1958_s6 + $0xa8] sm:$0xff] %v820_v33 }
 0x18c   : > { %v1265_v44 = vpop.f32.mrb[8].mxu0  ;;  %v1281_v46 = vpop.f32.mrb[8].mxu1 }
 0x18d   : > { %v777_v47 = vadd.f32 %v1265_v44, %v1951_v8  ;;  %v841_v48 = vadd.f32 %v1281_v46, %v1951_v8  ;;  %v768_v49 = vpop.f32.mrb[9].mxu0  ;;  %v832_v50 = vpop.f32.mrb[9].mxu1 }
 0x18e   : > { %v769_v51 = vadd.f32 %v768_v49, %v1951_v8  ;;  %v833_v30 = vadd.f32 %v832_v50, %v1951_v8  ;;  %v1266_v52 = vpop.f32.mrb[10].mxu0  ;;  %v1282_v53 = vpop.f32.mrb[10].mxu1 }
 0x18f   : > { %873 = vst [vmem:[%s1958_s6 + $0x50] sm:$0xff] %v777_v47  ;;  %889 = vst [vmem:[%s1958_s6 + $0xd0] sm:$0xff] %v841_v48  ;;  %v780_v36 = vadd.f32 %v1266_v52, %v1951_v8  ;;  %v844_v54 = vadd.f32 %v1282_v53, %v1951_v8  ;;  %v771_v40 = vpop.f32.mrb[11].mxu0  ;;  %v835_v55 = vpop.f32.mrb[11].mxu1 }
 0x190   : > { %871 = vst [vmem:[%s1958_s6 + $0x40] sm:$0xff] %v769_v51  ;;  %887 = vst [vmem:[%s1958_s6 + $0xc0] sm:$0xff] %v833_v30  ;;  %v772_v56 = vadd.f32 %v771_v40, %v1951_v8  ;;  %v836_v57 = vadd.f32 %v835_v55, %v1951_v8 }
 0x191   : > { %874 = vst [vmem:[%s1958_s6 + $0x58] sm:$0xff] %v780_v36  ;;  %890 = vst [vmem:[%s1958_s6 + $0xd8] sm:$0xff] %v844_v54 }
 0x192   : > { %872 = vst [vmem:[%s1958_s6 + $0x48] sm:$0xff] %v772_v56  ;;  %888 = vst [vmem:[%s1958_s6 + $0xc8] sm:$0xff] %v836_v57 }
 0x194   : > { %v1269_v45 = vpop.f32.mrb[12].mxu0  ;;  %v1285_v58 = vpop.f32.mrb[12].mxu1 }
 0x195   : > { %v793_v59 = vadd.f32 %v1269_v45, %v1951_v8  ;;  %v857_v60 = vadd.f32 %v1285_v58, %v1951_v8  ;;  %v784_v61 = vpop.f32.mrb[13].mxu0  ;;  %v848_v62 = vpop.f32.mrb[13].mxu1 }
 0x196   : > { %v785_v63 = vadd.f32 %v784_v61, %v1951_v8  ;;  %v849_v0 = vadd.f32 %v848_v62, %v1951_v8  ;;  %v1270_v1 = vpop.f32.mrb[14].mxu0  ;;  %v1286_v2 = vpop.f32.mrb[14].mxu1 }
 0x197   : > { %877 = vst [vmem:[%s1958_s6 + $0x70] sm:$0xff] %v793_v59  ;;  %893 = vst [vmem:[%s1958_s6 + $0xf0] sm:$0xff] %v857_v60  ;;  %v796_v3 = vadd.f32 %v1270_v1, %v1951_v8  ;;  %v860_v4 = vadd.f32 %v1286_v2, %v1951_v8  ;;  %v787_v5 = vpop.f32.mrb[15].mxu0  ;;  %v851_v6 = vpop.f32.mrb[15].mxu1 }
 0x198   : > { %875 = vst [vmem:[%s1958_s6 + $0x60] sm:$0xff] %v785_v63  ;;  %891 = vst [vmem:[%s1958_s6 + $0xe0] sm:$0xff] %v849_v0  ;;  %v788_v7 = vadd.f32 %v787_v5, %v1951_v8  ;;  %v852_v9 = vadd.f32 %v851_v6, %v1951_v8 }
 0x199   : > { %878 = vst [vmem:[%s1958_s6 + $0x78] sm:$0xff] %v796_v3  ;;  %894 = vst [vmem:[%s1958_s6 + $0xf8] sm:$0xff] %v860_v4 }
 0x19a   : > { %876 = vst [vmem:[%s1958_s6 + $0x68] sm:$0xff] %v788_v7  ;;  %892 = vst [vmem:[%s1958_s6 + $0xe8] sm:$0xff] %v852_v9 }
 0x19b   : > { %1490 = shalt.err (!%p1487_p5)
}
 0x19c   : > { %s1491_s25 = scalar_lea.hbm %s2017_s14, 4096  ;;  %s1495_s5 = scalar_lea.hbm %s2080_s4, 8192 }
 0x19d   : > { %p1492_p3 = scmp.ne.s32.totalorder %s2017_s14, %s1491_s25  ;;  %p1496_p13 = scmp.lt.u32.totalorder %s2017_s14, %s2080_s4 }
 0x19e   : > { %p1497_p2 = scmp.lt.u32.totalorder %s1495_s5, %s1491_s25  ;;  %p1499_p9 = scmp.lt.u32.totalorder %s1491_s25, %s2017_s14 }
 0x19f   : > { %p1493_p6 = pnand %p1492_p3, %p2101_p4 }
 0x1a0   : > { %p1498_p7 = por %p1497_p2, %p1496_p13 }
 0x1a1   : > { %p1494_p10 = pneg %p1493_p6 }
 0x1a2   : > { %p1500_p11 = por %p1499_p9, %p1498_p7 }
 0x1a4   : > { %p1501_p1 = pnand %p1500_p11, %p1494_p10 }
 0x1a6   : > { %1504 = shalt.err (!%p1501_p1)
}
 0x1a7   : > { %s1575_s13 = smov 128   ;;  %s1576_s18 = smov 8  }
 0x1a8   : > { %1313 = dma.vmem_to_hbm [thread:$0]  (%p2101_p4), %s2019_s11, 4096, %s2017_s14, %s896_s10, %s1575_s13, %s1575_s13, %s1576_s18  }
 0x1a9 PF: > { %s926_s9 = sand.u32 1, %s1547_s15   ;;  %p2102_p0 = scmp.ne.s32.totalorder %s2090_s27, 0 }
 0x1aa   : > { %p2103_p8 = scmp.ge.s32.totalorder %s1567_s20, 2  ;;  %s927_s23 = scalar_lea.sflag [#allocation5], %s926_s9 }
 0x1ac   : > { %p1327_p12 = pnand %p2103_p8, %p2102_p0 }
 0x1ae   : > { %1542 = dma.done.wait (!%p1327_p12), %s927_s23, 4096  }
 0x1af   : > { %1544 = vsyncadd (!%p1327_p12), %s927_s23, 4294963200  ;;  %s22_s20 = sadd.s32 1, %s1567_s20   ;;  %s2104_s15 = smov %s1551_s16 }
 0x1b0   : > { %p19_p5 = scmp.ge.s32.totalorder %s22_s20, 4   ;;  %s2105_s16 = smov %s1555_s17 }
 0x1b1   : > { %s2106_s17 = smov %s1781_s12  ;;  %s2107_s18 = smov %s1563_s19 }
 0x1b2   : > { %s2108_s19 = smov %s2110_s7  ;;  %21 = sbr.rel (!%p19_p5) target bundleno = 8 (0x8), region = 97 }
 0x1b9   :  { %932 = vsyncpa [#allocation4], 1 }
 0x1ba   :  { %934 = vsyncpa [#allocation4 + $0x1], 1 }
 0x1bb   :  { %935 = vsyncpa [#allocation9], 1 }
 0x1bc   :  { %936 = vsyncpa [#allocation5], 1 }
 0x1bd   :  { %938 = vsyncpa [#allocation5 + $0x1], 1 }
 0x1be   :  { %939 = vsyncpa [#allocation6], 1 }
 0x1bf   :  { %941 = vsyncpa [#allocation6 + $0x1], 1 }

</bundles_post_ra>
